<compile_context>
chip_gen: v5e
topology: v5e:2x2
jax: 0.10.0
libtpu: 0.0.40
codegen_flags: <defaults>
</compile_context>

<pallas_src>
import functools

import jax
import jax.numpy as jnp
from jax.experimental import pallas as pl
from jax.experimental.pallas import tpu as pltpu

_EPS = 1e-5


def _ceil_to(x, m):
    return ((x + m - 1) // m) * m


def _cp(c):
    """Channel count padded up to a multiple of 128 (TPU lane width)."""
    return _ceil_to(c, 128)


# ----------------------------------------------------------------------------
# Pallas kernels
# ----------------------------------------------------------------------------
def _matmul_bn_kernel(*refs, relu, has_res):
    """Tiled matmul (bf16 operands on the MXU, f32 accumulator) with fused folded-BN
    scale/bias, optional fused residual add and optional ReLU in the finalize."""
    if has_res:
        x_ref, w_ref, s_ref, b_ref, r_ref, o_ref, acc_ref = refs
    else:
        x_ref, w_ref, s_ref, b_ref, o_ref, acc_ref = refs
        r_ref = None
    k = pl.program_id(2)

    @pl.when(k == 0)
    def _init():
        acc_ref[...] = jnp.zeros_like(acc_ref)

    acc_ref[...] += jnp.dot(x_ref[...], w_ref[...],
                            preferred_element_type=jnp.float32)

    @pl.when(k == pl.num_programs(2) - 1)
    def _finalize():
        y = acc_ref[...] * s_ref[...] + b_ref[...]
        if has_res:
            y = y + r_ref[...].astype(jnp.float32)
        if relu:
            y = jnp.maximum(y, 0.0)
        o_ref[...] = y.astype(o_ref.dtype)


def _dw3x3_kernel(x_ref, w_ref, o_ref, *, relu_in):
    """Depthwise 3x3 / stride-1 conv on one zero-padded image, with the preceding
    ReLU optionally fused in.  Nine shifted in-VMEM taps, f32 accumulation."""
    h, w, c = o_ref.shape[1], o_ref.shape[2], o_ref.shape[3]
    x = x_ref[0]                                  # [H+2, W+2, C]
    if relu_in:
        x = jnp.maximum(x, 0.0)
    acc = None
    for ki in range(3):
        for kj in range(3):
            tap = x[ki:ki + h, kj:kj + w, :].astype(jnp.float32)
            wt = w_ref[ki * 3 + kj, :].reshape(1, 1, c)
            term = tap * wt
            acc = term if acc is None else acc + term
    o_ref[0] = acc.astype(o_ref.dtype)


def _maxpool3x3_kernel(x_ref, o_ref):
    """Dense (stride-1) 3x3 max over one padded image; the stride-2 subsample is a
    cheap slice outside the kernel (no 9x patch materialisation in HBM)."""
    h, w = o_ref.shape[1], o_ref.shape[2]
    x = x_ref[0]
    m = None
    for ki in range(3):
        for kj in range(3):
            v = x[ki:ki + h, kj:kj + w, :]
            m = v if m is None else jnp.maximum(m, v)
    o_ref[0] = m


def _avgpool_kernel(x_ref, o_ref):
    hw = x_ref.shape[1]
    s = jnp.sum(x_ref[...].astype(jnp.float32), axis=1, keepdims=True)
    o_ref[...] = s * (1.0 / float(hw))


# ----------------------------------------------------------------------------
# Pallas wrappers
# ----------------------------------------------------------------------------
@functools.partial(jax.jit, static_argnames=("relu",))
def matmul_bn(x, w, scale, bias, res, *, relu):
    """x:[M,K]bf16 @ w:[K,N]bf16 -> *scale + bias (+res) (+ReLU) -> [M,N]bf16.
    K and N are already multiples of 128 (weights are pre-padded once)."""
    m, k = x.shape
    n = w.shape[1]

    def _pick(d, cands):
        for c in cands:
            if d % c == 0:
                return c
        raise ValueError(f"dimension {d} is not a multiple of 128")

    tk = _pick(k, (512, 384, 256, 128))
    tn = _pick(n, (256, 128))
    # Small-M layers (deep spatial tail) get a tight sublane-aligned M tile instead of
    # padding all the way to 256.
    tm = _ceil_to(m, 8) if m <= 512 else 256
    mp = _ceil_to(m, tm)
    if mp != m:
        x = jnp.pad(x, ((0, mp - m), (0, 0)))
        if res is not None:
            res = jnp.pad(res, ((0, mp - m), (0, 0)))

    in_specs = [
        pl.BlockSpec((tm, tk), lambda i, j, kk: (i, kk)),
        pl.BlockSpec((tk, tn), lambda i, j, kk: (kk, j)),
        # scale/bias block index is k-independent -> not re-fetched across k steps.
        pl.BlockSpec((1, tn), lambda i, j, kk: (0, j)),
        pl.BlockSpec((1, tn), lambda i, j, kk: (0, j)),
    ]
    args = [x, w, scale, bias]
    if res is not None:
        in_specs.append(pl.BlockSpec((tm, tn), lambda i, j, kk: (i, j)))
        args.append(res)

    out = pl.pallas_call(
        functools.partial(_matmul_bn_kernel, relu=relu, has_res=res is not None),
        out_shape=jax.ShapeDtypeStruct((mp, n), jnp.bfloat16),
        grid_spec=pltpu.PrefetchScalarGridSpec(
            num_scalar_prefetch=0,
            grid=(mp // tm, n // tn, k // tk),
            in_specs=in_specs,
            out_specs=pl.BlockSpec((tm, tn), lambda i, j, kk: (i, j)),
            scratch_shapes=[pltpu.VMEM((tm, tn), jnp.float32)],
        ),
        compiler_params=pltpu.CompilerParams(
            dimension_semantics=("parallel", "parallel", "arbitrary"),
            vmem_limit_bytes=32 * 1024 * 1024,
        ),
    )(*args)
    return out[:m] if mp != m else out


@functools.partial(jax.jit, static_argnames=("relu_in",))
def depthwise3x3(x, w9c, *, relu_in):
    """3x3 depthwise conv, stride 1, padding 1, NHWC bf16.  w9c: [9, C] f32."""
    n, h, w, c = x.shape
    xp = jnp.pad(x, ((0, 0), (1, 1), (1, 1), (0, 0)))
    return pl.pallas_call(
        functools.partial(_dw3x3_kernel, relu_in=relu_in),
        out_shape=jax.ShapeDtypeStruct((n, h, w, c), x.dtype),
        grid_spec=pltpu.PrefetchScalarGridSpec(
            num_scalar_prefetch=0,
            grid=(n,),
            in_specs=[
                pl.BlockSpec((1, h + 2, w + 2, c), lambda i: (i, 0, 0, 0)),
                pl.BlockSpec((9, c), lambda i: (0, 0)),
            ],
            out_specs=pl.BlockSpec((1, h, w, c), lambda i: (i, 0, 0, 0)),
        ),
        compiler_params=pltpu.CompilerParams(
            dimension_semantics=("parallel",)),
    )(xp, w9c)


@jax.jit
def maxpool3x3_s2(x):
    """3x3 / stride-2 / pad-1 max pool on NHWC bf16."""
    n, h, w, c = x.shape
    pad_val = float(jnp.finfo(x.dtype).min)
    xp = jnp.pad(x, ((0, 0), (1, 1), (1, 1), (0, 0)), constant_values=pad_val)
    dense = pl.pallas_call(
        _maxpool3x3_kernel,
        out_shape=jax.ShapeDtypeStruct((n, h, w, c), x.dtype),
        grid_spec=pltpu.PrefetchScalarGridSpec(
            num_scalar_prefetch=0,
            grid=(n,),
            in_specs=[pl.BlockSpec((1, h + 2, w + 2, c), lambda i: (i, 0, 0, 0))],
            out_specs=pl.BlockSpec((1, h, w, c), lambda i: (i, 0, 0, 0)),
        ),
        compiler_params=pltpu.CompilerParams(
            dimension_semantics=("parallel",)),
    )(xp)
    return dense[:, ::2, ::2, :]


@jax.jit
def global_avgpool(x):
    """NHWC bf16 -> [N, C] f32 global average pool (AdaptiveAvgPool2d((1,1)) + flatten)."""
    n, h, w, c = x.shape
    x3 = x.reshape(n, h * w, c)
    out = pl.pallas_call(
        _avgpool_kernel,
        out_shape=jax.ShapeDtypeStruct((n, 1, c), jnp.float32),
        grid_spec=pltpu.PrefetchScalarGridSpec(
            num_scalar_prefetch=0,
            grid=(n,),
            in_specs=[pl.BlockSpec((1, h * w, c), lambda i: (i, 0, 0))],
            out_specs=pl.BlockSpec((1, 1, c), lambda i: (i, 0, 0)),
        ),
        compiler_params=pltpu.CompilerParams(
            dimension_semantics=("parallel",)),
    )(x3)
    return out.reshape(n, c)


# ----------------------------------------------------------------------------
# Glue: Xception structure
# ----------------------------------------------------------------------------
def _im2col3(x, stride):
    """NHWC -> [N*Ho*Wo, 9*C] patches for a 3x3 / padding-0 conv (entry flow only)."""
    n, h, w, c = x.shape
    ho = (h - 3) // stride + 1
    wo = (w - 3) // stride + 1
    cols = []
    for i in range(3):
        for j in range(3):
            cols.append(x[:, i:i + stride * ho:stride, j:j + stride * wo:stride, :])
    patches = jnp.stack(cols, axis=3)            # [N, Ho, Wo, 9, C]
    return patches.reshape(n * ho * wo, 9 * c), (n, ho, wo)


def conv3x3_bn(x, p, stride, relu):
    # TODO(synk): entry-flow conv1/conv2 still use im2col glue before the Pallas matmul
    # (these are the only non-separable convs in Xception and are tiny: 3->32, 32->64).
    patches, (n, ho, wo) = _im2col3(x, stride)
    kp = p["w"].shape[0]
    if patches.shape[1] != kp:                   # only conv1 (K = 27 -> 128)
        patches = jnp.pad(patches, ((0, 0), (0, kp - patches.shape[1])))
    y = matmul_bn(patches, p["w"], p["scale"], p["bias"], None, relu=relu)
    return y.reshape(n, ho, wo, -1)


def sepconv_bn(x, p, relu_in, relu_out=False, residual=None):
    """(ReLU) -> depthwise 3x3 -> pointwise 1x1 -> folded BN (+residual) (+ReLU)."""
    n, h, w, c = x.shape
    y = depthwise3x3(x, p["dw"], relu_in=relu_in)
    y2 = y.reshape(n * h * w, c)
    r2 = residual.reshape(n * h * w, residual.shape[-1]) if residual is not None else None
    out = matmul_bn(y2, p["pw"], p["scale"], p["bias"], r2, relu=relu_out)
    return out.reshape(n, h, w, -1)


def skip_conv_bn(x, p, stride, residual):
    """1x1 skip conv (stride s) + folded BN with the main branch fused as residual."""
    if stride != 1:
        x = x[:, ::stride, ::stride, :]
    n, h, w, c = x.shape
    x2 = x.reshape(n * h * w, c)
    r2 = residual.reshape(n * h * w, residual.shape[-1])
    out = matmul_bn(x2, p["w"], p["scale"], p["bias"], r2, relu=False)
    return out.reshape(n, h, w, -1)


def block_forward(x, p):
    inp = x
    y = x
    nsep = len(p["seps"])
    for i, sp in enumerate(p["seps"]):
        # Middle-flow blocks (identity skip): fuse the residual add into the last
        # pointwise matmul's finalize.
        res = inp if (p["skip"] is None and i == nsep - 1) else None
        y = sepconv_bn(y, sp, relu_in=p["relu_flags"][i], relu_out=False, residual=res)
    if p["stride"] != 1:
        y = maxpool3x3_s2(y)
    if p["skip"] is not None:
        # Strided blocks: the skip 1x1-conv matmul takes the pooled branch as residual.
        y = skip_conv_bn(inp, p["skip"], p["stride"], residual=y)
    return y


def xception_forward(x_nchw, params):
    """x_nchw: [N, 3, H, W] float32 (PyTorch layout) -> [N, 2048] float32 features."""
    x = jnp.transpose(x_nchw, (0, 2, 3, 1)).astype(jnp.bfloat16)      # NHWC, bf16
    x = conv3x3_bn(x, params["conv1"], stride=2, relu=True)           # conv1/bn1/relu
    x = conv3x3_bn(x, params["conv2"], stride=1, relu=True)           # conv2/bn2/relu
    for bp in params["blocks"]:                                       # block1..block12
        x = block_forward(x, bp)
    x = sepconv_bn(x, params["conv3"], relu_in=False, relu_out=True)  # conv3/bn3/relu
    x = sepconv_bn(x, params["conv4"], relu_in=False, relu_out=True)  # conv4/bn4/relu
    return global_avgpool(x)                                          # fc = Identity


# ----------------------------------------------------------------------------
# Deterministic synthetic parameters (timm 'xception' shapes, BN folded, pre-padded)
# ----------------------------------------------------------------------------
def _fold_bn(key, cout):
    k1, k2, k3, k4 = jax.random.split(key, 4)
    gamma = 1.0 + 0.1 * jax.random.normal(k1, (cout,), jnp.float32)
    beta = 0.1 * jax.random.normal(k2, (cout,), jnp.float32)
    mean = 0.1 * jax.random.normal(k3, (cout,), jnp.float32)
    var = 1.0 + 0.1 * jax.random.uniform(k4, (cout,), jnp.float32)
    scale = gamma / jnp.sqrt(var + _EPS)
    bias = beta - mean * scale
    return scale, bias


def _embed_sb(scale, bias, coutp):
    cout = scale.shape[0]
    sp = jnp.zeros((1, coutp), jnp.float32).at[0, :cout].set(scale)
    bp = jnp.zeros((1, coutp), jnp.float32).at[0, :cout].set(bias)
    return sp, bp


def _conv3x3_params(key, cin, cout, cin_tensor):
    """Regular 3x3 conv + folded BN (entry flow).  cin_tensor = channels actually
    present in the incoming tensor (3 for conv1, padded 128 for conv2)."""
    kw, kb = jax.random.split(key)
    coutp = _cp(cout)
    w = jax.random.normal(kw, (3, 3, cin, cout), jnp.float32)
    w = w * (0.5 * (2.0 / (9 * cin)) ** 0.5)
    wf = jnp.zeros((3, 3, cin_tensor, coutp), jnp.float32).at[:, :, :cin, :cout].set(w)
    kflat = 9 * cin_tensor
    kp = _ceil_to(kflat, 128)
    w2 = wf.reshape(kflat, coutp)
    if kp != kflat:
        w2 = jnp.pad(w2, ((0, kp - kflat), (0, 0)))
    scale, bias = _fold_bn(kb, cout)
    sp, bp = _embed_sb(scale, bias, coutp)
    return {"w": w2.astype(jnp.bfloat16), "scale": sp, "bias": bp}


def _sepconv_params(key, cin, cout):
    kdw, kpw, kb = jax.random.split(key, 3)
    cinp, coutp = _cp(cin), _cp(cout)
    dw = jax.random.normal(kdw, (3, 3, cin), jnp.float32) * (0.5 * (2.0 / 9.0) ** 0.5)
    dw_p = jnp.zeros((3, 3, cinp), jnp.float32).at[:, :, :cin].set(dw).reshape(9, cinp)
    pw = jax.random.normal(kpw, (cin, cout), jnp.float32) * (0.5 * (2.0 / cin) ** 0.5)
    pw_p = jnp.zeros((cinp, coutp), jnp.float32).at[:cin, :cout].set(pw)
    scale, bias = _fold_bn(kb, cout)
    sp, bp = _embed_sb(scale, bias, coutp)
    return {"dw": dw_p, "pw": pw_p.astype(jnp.bfloat16), "scale": sp, "bias": bp}


def _skip_params(key, cin, cout):
    kw, kb = jax.random.split(key)
    cinp, coutp = _cp(cin), _cp(cout)
    w = jax.random.normal(kw, (cin, cout), jnp.float32) * (0.5 * (2.0 / cin) ** 0.5)
    wp = jnp.zeros((cinp, coutp), jnp.float32).at[:cin, :cout].set(w)
    scale, bias = _fold_bn(kb, cout)
    sp, bp = _embed_sb(scale, bias, coutp)
    return {"w": wp.astype(jnp.bfloat16), "scale": sp, "bias": bp}


def _block_params(key, cin, cout, reps, stride, start_with_relu, grow_first):
    ks = jax.random.split(key, reps + 1)
    if grow_first:
        io = [(cin, cout)] + [(cout, cout)] * (reps - 1)
    else:
        io = [(cin, cin)] * (reps - 1) + [(cin, cout)]
    seps = [_sepconv_params(ks[i], a, b) for i, (a, b) in enumerate(io)]
    skip = _skip_params(ks[reps], cin, cout) if (cout != cin or stride != 1) else None
    return {"seps": seps,
            "relu_flags": tuple([start_with_relu] + [True] * (reps - 1)),
            "stride": stride,
            "skip": skip}


# timm 'xception' block configuration: (cin, cout, reps, stride, start_with_relu, grow_first)
_BLOCK_CFG = (
    (64, 128, 2, 2, False, True),
    (128, 256, 2, 2, True, True),
    (256, 728, 2, 2, True, True),
) + ((728, 728, 3, 1, True, True),) * 8 + (
    (728, 1024, 2, 2, True, False),
)


def make_xception_params(key):
    # TODO(synk): the real module freezes pretrained timm weights; deterministic
    # synthetic weights with identical shapes/structure are used here instead.
    keys = jax.random.split(key, 4 + len(_BLOCK_CFG))
    return {
        "conv1": _conv3x3_params(keys[0], 3, 32, cin_tensor=3),
        "conv2": _conv3x3_params(keys[1], 32, 64, cin_tensor=_cp(32)),
        "blocks": [_block_params(keys[2 + i], *cfg) for i, cfg in enumerate(_BLOCK_CFG)],
        "conv3": _sepconv_params(keys[2 + len(_BLOCK_CFG)], 1024, 1536),
        "conv4": _sepconv_params(keys[3 + len(_BLOCK_CFG)], 1536, 2048),
    }


# ----------------------------------------------------------------------------
if __name__ == "__main__":
    key = jax.random.PRNGKey(0)
    kx, kp = jax.random.split(key)

    # Small NCHW image batch (Xception takes 3-channel images; 32x32 keeps every
    # stage's spatial extent >= 1 through the five stride-2 stages).
    x = jax.random.normal(kx, (2, 3, 32, 32), jnp.float32)

    params = make_xception_params(kp)
    feat = xception_forward(x, params)
    feat = jax.block_until_ready(feat)

    assert feat.shape == (2, 2048), feat.shape      # output_size = fc.in_features = 2048
    assert feat.dtype == jnp.float32
    assert bool(jnp.all(jnp.isfinite(feat)))
    print("KERNEL_OK")
</pallas_src>

<mosaic_0001>
module attributes {stable_mosaic.version = 11 : i64} {
  func.func @_matmul_bn_kernel(%arg0: i32, %arg1: i32, %arg2: i32, %arg3: memref<456x128xbf16, #tpu.memory_space<vmem>>, %arg4: memref<128x128xbf16, #tpu.memory_space<vmem>>, %arg5: memref<1x128xf32, #tpu.memory_space<vmem>>, %arg6: memref<1x128xf32, #tpu.memory_space<vmem>>, %arg7: memref<456x128xbf16, #tpu.memory_space<vmem>>, %arg8: memref<456x128xf32, #tpu.memory_space<vmem>>) attributes {dimension_semantics = [#tpu.dimension_semantics<parallel>, #tpu.dimension_semantics<parallel>, #tpu.dimension_semantics<arbitrary>], iteration_bounds = array<i64: 1, 1, 1>, scalar_prefetch = 0 : i64, scratch_operands = 1 : i64, tpu.core_type = #tpu.core_type<tc>, window_params = [{transform_indices = @transform_0, window_bounds = array<i64: 456, 128>}, {transform_indices = @transform_1, window_bounds = array<i64: 128, 128>}, {transform_indices = @transform_2, window_bounds = array<i64: 1, 128>}, {transform_indices = @transform_3, window_bounds = array<i64: 1, 128>}, {transform_indices = @transform_4, window_bounds = array<i64: 456, 128>}]} {
    %c0_i32 = arith.constant 0 : i32
    %0 = arith.cmpi eq, %arg2, %c0_i32 : i32
    %1 = arith.extui %0 : i1 to i32
    %c0_i32_0 = arith.constant 0 : i32
    %2 = arith.cmpi ne, %1, %c0_i32_0 : i32
    scf.if %2 {
      %cst_10 = arith.constant 0.000000e+00 : f32
      %12 = vector.broadcast %cst_10 : f32 to vector<456x128xf32>
      %c0_11 = arith.constant 0 : index
      %c0_12 = arith.constant 0 : index
      %13 = vector.load %arg8[%c0_11, %c0_12] : memref<456x128xf32, #tpu.memory_space<vmem>>, vector<456x128xf32>
      tpu.vector_store %arg8[%c0_11, %c0_12], %12 {strides = array<i32>} : memref<456x128xf32, #tpu.memory_space<vmem>>, vector<456x128xf32>,
    } else {
    }
    %c0 = arith.constant 0 : index
    %c0_1 = arith.constant 0 : index
    %3 = vector.load %arg8[%c0, %c0_1] : memref<456x128xf32, #tpu.memory_space<vmem>>, vector<456x128xf32>
    %c0_2 = arith.constant 0 : index
    %c0_3 = arith.constant 0 : index
    %4 = vector.load %arg3[%c0_2, %c0_3] : memref<456x128xbf16, #tpu.memory_space<vmem>>, vector<456x128xbf16>
    %c0_4 = arith.constant 0 : index
    %c0_5 = arith.constant 0 : index
    %5 = vector.load %arg4[%c0_4, %c0_5] : memref<128x128xbf16, #tpu.memory_space<vmem>>, vector<128x128xbf16>
    %cst = arith.constant dense<0.000000e+00> : vector<456x128xf32>
    %6 = tpu.matmul %4, %5, %cst {dimension_numbers = #tpu.dot_dimension_numbers<[1], [0], [0], [1], [0, 0, 1, 1], [], []>} : vector<456x128xbf16>, vector<128x128xbf16>, vector<456x128xf32> -> vector<456x128xf32>
    %7 = arith.addf %3, %6 : vector<456x128xf32>
    %c0_6 = arith.constant 0 : index
    %c0_7 = arith.constant 0 : index
    %8 = vector.load %arg8[%c0_6, %c0_7] : memref<456x128xf32, #tpu.memory_space<vmem>>, vector<456x128xf32>
    tpu.vector_store %arg8[%c0_6, %c0_7], %7 {strides = array<i32>} : memref<456x128xf32, #tpu.memory_space<vmem>>, vector<456x128xf32>,
    %c0_i32_8 = arith.constant 0 : i32
    %9 = arith.cmpi eq, %arg2, %c0_i32_8 : i32
    %10 = arith.extui %9 : i1 to i32
    %c0_i32_9 = arith.constant 0 : i32
    %11 = arith.cmpi ne, %10, %c0_i32_9 : i32
    scf.if %11 {
      %c0_10 = arith.constant 0 : index
      %c0_11 = arith.constant 0 : index
      %12 = vector.load %arg8[%c0_10, %c0_11] : memref<456x128xf32, #tpu.memory_space<vmem>>, vector<456x128xf32>
      %c0_12 = arith.constant 0 : index
      %c0_13 = arith.constant 0 : index
      %13 = vector.load %arg5[%c0_12, %c0_13] : memref<1x128xf32, #tpu.memory_space<vmem>>, vector<1x128xf32>
      %14 = vector.broadcast %13 : vector<1x128xf32> to vector<456x128xf32>
      %15 = arith.mulf %12, %14 : vector<456x128xf32>
      %c0_14 = arith.constant 0 : index
      %c0_15 = arith.constant 0 : index
      %16 = vector.load %arg6[%c0_14, %c0_15] : memref<1x128xf32, #tpu.memory_space<vmem>>, vector<1x128xf32>
      %17 = vector.broadcast %16 : vector<1x128xf32> to vector<456x128xf32>
      %18 = arith.addf %15, %17 : vector<456x128xf32>
      %cst_16 = arith.constant 0.000000e+00 : f32
      %19 = vector.broadcast %cst_16 : f32 to vector<456x128xf32>
      %20 = arith.maximumf %18, %19 : vector<456x128xf32>
      %21 = arith.truncf %20 : vector<456x128xf32> to vector<456x128xbf16>
      %c0_17 = arith.constant 0 : index
      %c0_18 = arith.constant 0 : index
      %22 = vector.load %arg7[%c0_17, %c0_18] : memref<456x128xbf16, #tpu.memory_space<vmem>>, vector<456x128xbf16>
      tpu.vector_store %arg7[%c0_17, %c0_18], %21 {strides = array<i32>} : memref<456x128xbf16, #tpu.memory_space<vmem>>, vector<456x128xbf16>,
    } else {
    }
    return
  }
  func.func @transform_0(%arg0: i32, %arg1: i32, %arg2: i32) -> (i32, i32) {
    %c0_i32 = arith.constant 0 : i32
    return %arg0, %arg2 : i32, i32
  }
  func.func @transform_1(%arg0: i32, %arg1: i32, %arg2: i32) -> (i32, i32) {
    %c0_i32 = arith.constant 0 : i32
    return %arg2, %arg1 : i32, i32
  }
  func.func @transform_2(%arg0: i32, %arg1: i32, %arg2: i32) -> (i32, i32) {
    %c0_i32 = arith.constant 0 : i32
    %c0_i32_0 = arith.constant 0 : i32
    return %c0_i32, %arg1 : i32, i32
  }
  func.func @transform_3(%arg0: i32, %arg1: i32, %arg2: i32) -> (i32, i32) {
    %c0_i32 = arith.constant 0 : i32
    %c0_i32_0 = arith.constant 0 : i32
    return %c0_i32, %arg1 : i32, i32
  }
  func.func @transform_4(%arg0: i32, %arg1: i32, %arg2: i32) -> (i32, i32) {
    %c0_i32 = arith.constant 0 : i32
    return %arg0, %arg1 : i32, i32
  }
}

</mosaic_0001>

<bundles_post_ra>
// kernel: matmul_bn.1
= control target key start
LH: loop header
LB: loop body
LE: loop exit
PB: predicated region body
PF: predicated region fallthrough
CT: control target
= control target key end

     0   :  { %s1735_s0 = inlined_call_operand.vmem [shape: bf16[456,128], index: 0, kind: input, shape index: {}]   ;;  %s1736_s1 = inlined_call_operand.vmem [shape: bf16[128,128], index: 1, kind: input, shape index: {}]   ;;  %s1737_s2 = inlined_call_operand.vmem [shape: f32[1,128], index: 2, kind: input, shape index: {}]   ;;  %s1738_s3 = inlined_call_operand.vmem [shape: f32[1,128], index: 3, kind: input, shape index: {}]   ;;  %s1739_s4 = inlined_call_operand.hbm [shape: bf16[456,128], index: 4, kind: output, shape index: {}]  }
   0x1   :  { %v1246_v0 = vld [vmem:[%s1736_s1 + $0x38] sm:$0xff]  ;;  %v1245_v1 = vld [vmem:[%s1736_s1 + $0x30] sm:$0xff] }
   0x2   :  { %1415 = vmatpush.bf16.msra.mxu2 %v1246_v0  ;;  %429 = vmatpush.bf16.msra.mxu0 %v1246_v0 }
   0x3   :  { %1414 = vmatpush.bf16.msra.mxu1 %v1246_v0  ;;  %1416 = vmatpush.bf16.msra.mxu3 %v1246_v0 }
   0x4   :  { %9 = vsyncpa [#allocation4], 0  ;;  %v1244_v2 = vld [vmem:[%s1736_s1 + $0x28] sm:$0xff]  ;;  %v1243_v3 = vld [vmem:[%s1736_s1 + $0x20] sm:$0xff]  ;;  %s1055_s13 = sshll.u32 %s1739_s4, 4  ;;  %s1470_s14 = smov 64   ;;  %s1056_s13 = int_to_ptr.hbm [resolvable:$true] %s1055_s13 }
   0x5   :  { %v1242_v4 = vld [vmem:[%s1736_s1 + $0x18] sm:$0xff]  ;;  %v1241_v5 = vld [vmem:[%s1736_s1 + $0x10] sm:$0xff]  ;;  %v1240_v6 = vld [vmem:[%s1736_s1 + $0x8] sm:$0xff]  ;;  %s1471_s15 = smov 4  }
   0x6   :  { %1418 = vmatpush.bf16.msra.mxu2 %v1245_v1  ;;  %430 = vmatpush.bf16.msra.mxu0 %v1245_v1  ;;  %v1239_v7 = vld [vmem:[%s1736_s1] sm:$0xff]  ;;  %v1225_v8 = vld [vmem:[%s1735_s0 + $0x70] sm:$0xff]  ;;  %v1218_v10 = vld [vmem:[%s1735_s0 + $0x38] sm:$0xff] }
   0x7   :  { %1417 = vmatpush.bf16.msra.mxu1 %v1245_v1  ;;  %1419 = vmatpush.bf16.msra.mxu3 %v1245_v1  ;;  %v1211_v9 = vld [vmem:[%s1735_s0] sm:$0xff]  ;;  %v1233_v11 = vld [vmem:[%s1735_s0 + $0xb0] sm:$0xff]  ;;  %v1226_v12 = vld [vmem:[%s1735_s0 + $0x78] sm:$0xff] }
   0x8   :  { %v1212_v13 = vld [vmem:[%s1735_s0 + $0x8] sm:$0xff]  ;;  %v1219_v14 = vld [vmem:[%s1735_s0 + $0x40] sm:$0xff]  ;;  %v1234_v15 = vld [vmem:[%s1735_s0 + $0xb8] sm:$0xff] }
   0x9   :  { %v1227_v16 = vld [vmem:[%s1735_s0 + $0x80] sm:$0xff]  ;;  %v1213_v17 = vld [vmem:[%s1735_s0 + $0x10] sm:$0xff]  ;;  %v1220_v18 = vld [vmem:[%s1735_s0 + $0x48] sm:$0xff] }
   0xa   :  { %1421 = vmatpush.bf16.msra.mxu2 %v1244_v2  ;;  %431 = vmatpush.bf16.msra.mxu0 %v1244_v2  ;;  %v1235_v19 = vld [vmem:[%s1735_s0 + $0xc0] sm:$0xff]  ;;  %v1228_v20 = vld [vmem:[%s1735_s0 + $0x88] sm:$0xff]  ;;  %v1214_v21 = vld [vmem:[%s1735_s0 + $0x18] sm:$0xff] }
   0xb   :  { %1420 = vmatpush.bf16.msra.mxu1 %v1244_v2  ;;  %1422 = vmatpush.bf16.msra.mxu3 %v1244_v2  ;;  %v1221_v22 = vld [vmem:[%s1735_s0 + $0x50] sm:$0xff]  ;;  %v1236_v23 = vld [vmem:[%s1735_s0 + $0xc8] sm:$0xff]  ;;  %v1215_v25 = vld [vmem:[%s1735_s0 + $0x20] sm:$0xff] }
   0xc   :  { %v1229_v24 = vld [vmem:[%s1735_s0 + $0x90] sm:$0xff]  ;;  %v1222_v26 = vld [vmem:[%s1735_s0 + $0x58] sm:$0xff]  ;;  %v1216_v29 = vld [vmem:[%s1735_s0 + $0x28] sm:$0xff] }
   0xd   :  { %v1237_v27 = vld [vmem:[%s1735_s0 + $0xd0] sm:$0xff]  ;;  %v1230_v28 = vld [vmem:[%s1735_s0 + $0x98] sm:$0xff]  ;;  %v1223_v30 = vld [vmem:[%s1735_s0 + $0x60] sm:$0xff] }
   0xe   :  { %1424 = vmatpush.bf16.msra.mxu2 %v1243_v3  ;;  %432 = vmatpush.bf16.msra.mxu0 %v1243_v3  ;;  %v1238_v31 = vld [vmem:[%s1735_s0 + $0xd8] sm:$0xff]  ;;  %v192_v32 = vld [vmem:[%s1735_s0 + $0xe0] sm:$0xf]  ;;  %v1217_v35 = vld [vmem:[%s1735_s0 + $0x30] sm:$0xff] }
   0xf   :  { %1423 = vmatpush.bf16.msra.mxu1 %v1243_v3  ;;  %1425 = vmatpush.bf16.msra.mxu3 %v1243_v3  ;;  %v322_v33 = vunpack.c.l.b16 %v192_v32  ;;  %v1231_v34 = vld [vmem:[%s1735_s0 + $0xa0] sm:$0xff]  ;;  %v1224_v36 = vld [vmem:[%s1735_s0 + $0x68] sm:$0xff] }
  0x10   :  { %v1232_v38 = vld [vmem:[%s1735_s0 + $0xa8] sm:$0xff]  ;;  %v1611_v40 = vld [vmem:[%s1737_s2] ss:$0 sm:$0xff]  ;;  %s1469_s0 = smov [#allocation3]  }
  0x11   :  { %v351_v37 = vpack.c.b16 %v322_v33, %v322_v33  ;;  %v1618_v44 = vld [vmem:[%s1738_s3] ss:$0 sm:$0xff]  ;;  %s1053_s2 = sshll.u32 %s1469_s0, 4  ;;  %s1054_s2 = int_to_ptr.vmem [resolvable:$true] %s1053_s2 }
  0x12   :  { %1427 = vmatpush.bf16.msra.mxu2 %v1242_v4  ;;  %433 = vmatpush.bf16.msra.mxu0 %v1242_v4 }
  0x13   :  { %1426 = vmatpush.bf16.msra.mxu1 %v1242_v4  ;;  %1428 = vmatpush.bf16.msra.mxu3 %v1242_v4 }
  0x16   :  { %1430 = vmatpush.bf16.msra.mxu2 %v1241_v5  ;;  %434 = vmatpush.bf16.msra.mxu0 %v1241_v5 }
  0x17   :  { %1429 = vmatpush.bf16.msra.mxu1 %v1241_v5  ;;  %1431 = vmatpush.bf16.msra.mxu3 %v1241_v5 }
  0x1a   :  { %1433 = vmatpush.bf16.msra.mxu2 %v1240_v6  ;;  %435 = vmatpush.bf16.msra.mxu0 %v1240_v6 }
  0x1b   :  { %1432 = vmatpush.bf16.msra.mxu1 %v1240_v6  ;;  %1434 = vmatpush.bf16.msra.mxu3 %v1240_v6 }
  0x1e   :  { %1436 = vmatpush.bf16.msra.mxu2 %v1239_v7  ;;  %436 = vmatpush.bf16.msra.mxu0 %v1239_v7 }
  0x1f   :  { %1435 = vmatpush.bf16.msra.mxu1 %v1239_v7  ;;  %1437 = vmatpush.bf16.msra.mxu3 %v1239_v7 }
  0x21   :  { %507 = vmatmul.bf16.vlgmr.msra.gmra.mxu2 %v1225_v8  ;;  %437 = vmatmul.bf16.vlgmr.msra.gmra.mxu0 %v1211_v9 }
  0x22   :  { %472 = vmatmul.bf16.vlgmr.msra.gmra.mxu1 %v1218_v10  ;;  %547 = vmatmul.bf16.vlgmr.msra.gmra.mxu3 %v1233_v11 }
  0x31   :  { %512 = vmatmul.bf16.gmra.mxu2 %v1226_v12  ;;  %442 = vmatmul.bf16.gmra.mxu0 %v1212_v13 }
  0x32   :  { %477 = vmatmul.bf16.gmra.mxu1 %v1219_v14  ;;  %552 = vmatmul.bf16.gmra.mxu3 %v1234_v15 }
  0x41   :  { %517 = vmatmul.bf16.gmra.mxu2 %v1227_v16  ;;  %447 = vmatmul.bf16.gmra.mxu0 %v1213_v17 }
  0x42   :  { %482 = vmatmul.bf16.gmra.mxu1 %v1220_v18  ;;  %557 = vmatmul.bf16.gmra.mxu3 %v1235_v19 }
  0x51   :  { %522 = vmatmul.bf16.gmra.mxu2 %v1228_v20  ;;  %452 = vmatmul.bf16.gmra.mxu0 %v1214_v21 }
  0x52   :  { %487 = vmatmul.bf16.gmra.mxu1 %v1221_v22  ;;  %562 = vmatmul.bf16.gmra.mxu3 %v1236_v23 }
  0x61   :  { %527 = vmatmul.bf16.gmra.mxu2 %v1229_v24  ;;  %457 = vmatmul.bf16.gmra.mxu0 %v1215_v25 }
  0x62   :  { %492 = vmatmul.bf16.gmra.mxu1 %v1222_v26  ;;  %567 = vmatmul.bf16.gmra.mxu3 %v1237_v27 }
  0x71   :  { %532 = vmatmul.bf16.gmra.mxu2 %v1230_v28  ;;  %462 = vmatmul.bf16.gmra.mxu0 %v1216_v29 }
  0x72   :  { %497 = vmatmul.bf16.gmra.mxu1 %v1223_v30  ;;  %572 = vmatmul.bf16.gmra.mxu3 %v1238_v31 }
  0x81   :  { %537 = vmatmul.bf16.gmra.mxu2 %v1231_v34  ;;  %467 = vmatmul.bf16.gmra.mxu0 %v1217_v35 }
  0x82   :  { %502 = vmatmul.bf16.gmra.mxu1 %v1224_v36  ;;  %577 = vmatmul.bf16.gmra.mxu3 %v351_v37 }
  0x91   :  { %542 = vmatmul.bf16.gmra.mxu2 %v1232_v38 }
  0x9e   :  { %v438_v39 = vpop.f32.mrf.mxu0 }
  0x9f   :  { %v473_v41 = vpop.f32.mrf.mxu1  ;;  %v760_v42 = vmul.f32 %v1611_v40, %v438_v39 }
  0xa0   :  { %v774_v43 = vmul.f32 %v1611_v40, %v473_v41 }
  0xa1   :  { %v821_v46 = vadd.f32 %v1618_v44, %v760_v42 }
  0xa2   :  { %v835_v48 = vadd.f32 %v1618_v44, %v774_v43 }
  0xa3   :  { %v878_v55 = vmax.f32 %v821_v46, 0.0 }
  0xa4   :  { %v508_v45 = vpop.f32.mrf.mxu2  ;;  %v892_v57 = vmax.f32 %v835_v48, 0.0 }
  0xa5   :  { %v548_v47 = vpop.f32.mrf.mxu3  ;;  %v788_v54 = vmul.f32 %v1611_v40, %v508_v45 }
  0xa6   :  { %v440_v49 = vpop.f32.mrf.mxu0  ;;  %v804_v53 = vmul.f32 %v1611_v40, %v548_v47 }
  0xa7   :  { %v761_v50 = vmul.f32 %v1611_v40, %v440_v49  ;;  %v475_v51 = vpop.f32.mrf.mxu1  ;;  %v849_v63 = vadd.f32 %v1618_v44, %v788_v54 }
  0xa8   :  { %v775_v52 = vmul.f32 %v1611_v40, %v475_v51  ;;  %v865_v62 = vadd.f32 %v1618_v44, %v804_v53 }
  0xa9   :  { %v822_v56 = vadd.f32 %v1618_v44, %v761_v50  ;;  %v906_v10 = vmax.f32 %v849_v63, 0.0 }
  0xaa   :  { %v836_v58 = vadd.f32 %v1618_v44, %v775_v52  ;;  %v922_v8 = vmax.f32 %v865_v62, 0.0 }
  0xab   :  { %v879_v59 = vmax.f32 %v822_v56, 0.0 }
  0xac   :  { %v510_v60 = vpop.f32.mrf.mxu2  ;;  %v893_v61 = vmax.f32 %v836_v58, 0.0 }
  0xad   :  { %v789_v0 = vmul.f32 %v1611_v40, %v510_v60  ;;  %v1250_v1 = vpack.c.bf16 %v879_v59, %v878_v55  ;;  %v550_v2 = vpop.f32.mrf.mxu3 }
  0xae   :  { %v1285_v3 = vpack.c.bf16 %v893_v61, %v892_v57  ;;  %v443_v4 = vpop.f32.mrf.mxu0  ;;  %v805_v5 = vmul.f32 %v1611_v40, %v550_v2 }
  0xaf   :  { %v850_v6 = vadd.f32 %v1618_v44, %v789_v0  ;;  %1251 = vst [vmem:[#allocation3] sm:$0xff] %v1250_v1   ;;  %v478_v7 = vpop.f32.mrf.mxu1  ;;  %v762_v12 = vmul.f32 %v1611_v40, %v443_v4 }
  0xb0   :  { %1393 = vst [vmem:[#allocation3 + $0x38] sm:$0xff] %v1285_v3   ;;  %v866_v9 = vadd.f32 %v1618_v44, %v805_v5  ;;  %v776_v13 = vmul.f32 %v1611_v40, %v478_v7 }
  0xb1   :  { %v907_v11 = vmax.f32 %v850_v6, 0.0  ;;  %v823_v18 = vadd.f32 %v1618_v44, %v762_v12 }
  0xb2   :  { %v923_v14 = vmax.f32 %v866_v9, 0.0  ;;  %v837_v20 = vadd.f32 %v1618_v44, %v776_v13 }
  0xb3   :  { %v1320_v15 = vpack.c.bf16 %v907_v11, %v906_v10  ;;  %v880_v27 = vmax.f32 %v823_v18, 0.0 }
  0xb4   :  { %v513_v16 = vpop.f32.mrf.mxu2  ;;  %v1360_v17 = vpack.c.bf16 %v923_v14, %v922_v8  ;;  %v894_v29 = vmax.f32 %v837_v20, 0.0 }
  0xb5   :  { %1400 = vst [vmem:[#allocation3 + $0x70] sm:$0xff] %v1320_v15   ;;  %v553_v19 = vpop.f32.mrf.mxu3  ;;  %v790_v26 = vmul.f32 %v1611_v40, %v513_v16 }
  0xb6   :  { %1408 = vst [vmem:[#allocation3 + $0xb0] sm:$0xff] %v1360_v17   ;;  %v445_v21 = vpop.f32.mrf.mxu0  ;;  %v806_v25 = vmul.f32 %v1611_v40, %v553_v19 }
  0xb7   :  { %v763_v22 = vmul.f32 %v1611_v40, %v445_v21  ;;  %v480_v23 = vpop.f32.mrf.mxu1  ;;  %v851_v35 = vadd.f32 %v1618_v44, %v790_v26 }
  0xb8   :  { %v777_v24 = vmul.f32 %v1611_v40, %v480_v23  ;;  %v867_v34 = vadd.f32 %v1618_v44, %v806_v25 }
  0xb9   :  { %v824_v28 = vadd.f32 %v1618_v44, %v763_v22  ;;  %v908_v48 = vmax.f32 %v851_v35, 0.0 }
  0xba   :  { %v838_v30 = vadd.f32 %v1618_v44, %v777_v24  ;;  %v924_v46 = vmax.f32 %v867_v34, 0.0 }
  0xbb   :  { %v881_v31 = vmax.f32 %v824_v28, 0.0 }
  0xbc   :  { %v515_v32 = vpop.f32.mrf.mxu2  ;;  %v895_v33 = vmax.f32 %v838_v30, 0.0 }
  0xbd   :  { %v791_v36 = vmul.f32 %v1611_v40, %v515_v32  ;;  %v1255_v37 = vpack.c.bf16 %v881_v31, %v880_v27  ;;  %v555_v38 = vpop.f32.mrf.mxu3 }
  0xbe   :  { %v1290_v39 = vpack.c.bf16 %v895_v33, %v894_v29  ;;  %v448_v41 = vpop.f32.mrf.mxu0  ;;  %v807_v42 = vmul.f32 %v1611_v40, %v555_v38 }
  0xbf   :  { %v852_v43 = vadd.f32 %v1618_v44, %v791_v36  ;;  %1387 = vst [vmem:[#allocation3 + $0x8] sm:$0xff] %v1255_v37   ;;  %v483_v45 = vpop.f32.mrf.mxu1  ;;  %v764_v50 = vmul.f32 %v1611_v40, %v448_v41 }
  0xc0   :  { %1394 = vst [vmem:[#allocation3 + $0x40] sm:$0xff] %v1290_v39   ;;  %v868_v47 = vadd.f32 %v1618_v44, %v807_v42  ;;  %v778_v51 = vmul.f32 %v1611_v40, %v483_v45 }
  0xc1   :  { %v909_v49 = vmax.f32 %v852_v43, 0.0  ;;  %v825_v56 = vadd.f32 %v1618_v44, %v764_v50 }
  0xc2   :  { %v925_v52 = vmax.f32 %v868_v47, 0.0  ;;  %v839_v58 = vadd.f32 %v1618_v44, %v778_v51 }
  0xc3   :  { %v1325_v53 = vpack.c.bf16 %v909_v49, %v908_v48  ;;  %v882_v1 = vmax.f32 %v825_v56, 0.0 }
  0xc4   :  { %v518_v54 = vpop.f32.mrf.mxu2  ;;  %v1365_v55 = vpack.c.bf16 %v925_v52, %v924_v46  ;;  %v896_v3 = vmax.f32 %v839_v58, 0.0 }
  0xc5   :  { %1401 = vst [vmem:[#allocation3 + $0x78] sm:$0xff] %v1325_v53   ;;  %v558_v57 = vpop.f32.mrf.mxu3  ;;  %v792_v0 = vmul.f32 %v1611_v40, %v518_v54 }
  0xc6   :  { %1409 = vst [vmem:[#allocation3 + $0xb8] sm:$0xff] %v1365_v55   ;;  %v450_v59 = vpop.f32.mrf.mxu0  ;;  %v808_v63 = vmul.f32 %v1611_v40, %v558_v57 }
  0xc7   :  { %v765_v60 = vmul.f32 %v1611_v40, %v450_v59  ;;  %v485_v61 = vpop.f32.mrf.mxu1  ;;  %v853_v9 = vadd.f32 %v1618_v44, %v792_v0 }
  0xc8   :  { %v779_v62 = vmul.f32 %v1611_v40, %v485_v61  ;;  %v869_v8 = vadd.f32 %v1618_v44, %v808_v63 }
  0xc9   :  { %v826_v2 = vadd.f32 %v1618_v44, %v765_v60  ;;  %v910_v20 = vmax.f32 %v853_v9, 0.0 }
  0xca   :  { %v840_v4 = vadd.f32 %v1618_v44, %v779_v62  ;;  %v926_v18 = vmax.f32 %v869_v8, 0.0 }
  0xcb   :  { %v883_v5 = vmax.f32 %v826_v2, 0.0 }
  0xcc   :  { %v520_v6 = vpop.f32.mrf.mxu2  ;;  %v897_v7 = vmax.f32 %v840_v4, 0.0 }
  0xcd   :  { %v793_v10 = vmul.f32 %v1611_v40, %v520_v6  ;;  %v1260_v11 = vpack.c.bf16 %v883_v5, %v882_v1  ;;  %v560_v12 = vpop.f32.mrf.mxu3 }
  0xce   :  { %v1295_v13 = vpack.c.bf16 %v897_v7, %v896_v3  ;;  %v453_v14 = vpop.f32.mrf.mxu0  ;;  %v809_v15 = vmul.f32 %v1611_v40, %v560_v12 }
  0xcf   :  { %v854_v16 = vadd.f32 %v1618_v44, %v793_v10  ;;  %1388 = vst [vmem:[#allocation3 + $0x10] sm:$0xff] %v1260_v11   ;;  %v488_v17 = vpop.f32.mrf.mxu1  ;;  %v766_v22 = vmul.f32 %v1611_v40, %v453_v14 }
  0xd0   :  { %1395 = vst [vmem:[#allocation3 + $0x48] sm:$0xff] %v1295_v13   ;;  %v870_v19 = vadd.f32 %v1618_v44, %v809_v15  ;;  %v780_v23 = vmul.f32 %v1611_v40, %v488_v17 }
  0xd1   :  { %v911_v21 = vmax.f32 %v854_v16, 0.0  ;;  %v827_v28 = vadd.f32 %v1618_v44, %v766_v22 }
  0xd2   :  { %v927_v24 = vmax.f32 %v870_v19, 0.0  ;;  %v841_v30 = vadd.f32 %v1618_v44, %v780_v23 }
  0xd3   :  { %v1330_v25 = vpack.c.bf16 %v911_v21, %v910_v20  ;;  %v884_v37 = vmax.f32 %v827_v28, 0.0 }
  0xd4   :  { %v523_v26 = vpop.f32.mrf.mxu2  ;;  %v1370_v27 = vpack.c.bf16 %v927_v24, %v926_v18  ;;  %v898_v39 = vmax.f32 %v841_v30, 0.0 }
  0xd5   :  { %1402 = vst [vmem:[#allocation3 + $0x80] sm:$0xff] %v1330_v25   ;;  %v563_v29 = vpop.f32.mrf.mxu3  ;;  %v794_v36 = vmul.f32 %v1611_v40, %v523_v26 }
  0xd6   :  { %1410 = vst [vmem:[#allocation3 + $0xc0] sm:$0xff] %v1370_v27   ;;  %v455_v31 = vpop.f32.mrf.mxu0  ;;  %v810_v35 = vmul.f32 %v1611_v40, %v563_v29 }
  0xd7   :  { %v767_v32 = vmul.f32 %v1611_v40, %v455_v31  ;;  %v490_v33 = vpop.f32.mrf.mxu1  ;;  %v855_v47 = vadd.f32 %v1618_v44, %v794_v36 }
  0xd8   :  { %v781_v34 = vmul.f32 %v1611_v40, %v490_v33  ;;  %v871_v46 = vadd.f32 %v1618_v44, %v810_v35 }
  0xd9   :  { %v828_v38 = vadd.f32 %v1618_v44, %v767_v32  ;;  %v912_v58 = vmax.f32 %v855_v47, 0.0 }
  0xda   :  { %v842_v41 = vadd.f32 %v1618_v44, %v781_v34  ;;  %v928_v56 = vmax.f32 %v871_v46, 0.0 }
  0xdb   :  { %v885_v42 = vmax.f32 %v828_v38, 0.0 }
  0xdc   :  { %v525_v43 = vpop.f32.mrf.mxu2  ;;  %v899_v45 = vmax.f32 %v842_v41, 0.0 }
  0xdd   :  { %v795_v48 = vmul.f32 %v1611_v40, %v525_v43  ;;  %v1265_v49 = vpack.c.bf16 %v885_v42, %v884_v37  ;;  %v565_v50 = vpop.f32.mrf.mxu3 }
  0xde   :  { %v1300_v51 = vpack.c.bf16 %v899_v45, %v898_v39  ;;  %v458_v52 = vpop.f32.mrf.mxu0  ;;  %v811_v53 = vmul.f32 %v1611_v40, %v565_v50 }
  0xdf   :  { %v856_v54 = vadd.f32 %v1618_v44, %v795_v48  ;;  %1389 = vst [vmem:[#allocation3 + $0x18] sm:$0xff] %v1265_v49   ;;  %v493_v55 = vpop.f32.mrf.mxu1  ;;  %v768_v60 = vmul.f32 %v1611_v40, %v458_v52 }
  0xe0   :  { %1396 = vst [vmem:[#allocation3 + $0x50] sm:$0xff] %v1300_v51   ;;  %v872_v57 = vadd.f32 %v1618_v44, %v811_v53  ;;  %v782_v61 = vmul.f32 %v1611_v40, %v493_v55 }
  0xe1   :  { %v913_v59 = vmax.f32 %v856_v54, 0.0  ;;  %v829_v2 = vadd.f32 %v1618_v44, %v768_v60 }
  0xe2   :  { %v929_v62 = vmax.f32 %v872_v57, 0.0  ;;  %v843_v4 = vadd.f32 %v1618_v44, %v782_v61 }
  0xe3   :  { %v1335_v63 = vpack.c.bf16 %v913_v59, %v912_v58  ;;  %v886_v11 = vmax.f32 %v829_v2, 0.0 }
  0xe4   :  { %v528_v0 = vpop.f32.mrf.mxu2  ;;  %v1375_v1 = vpack.c.bf16 %v929_v62, %v928_v56  ;;  %v900_v13 = vmax.f32 %v843_v4, 0.0 }
  0xe5   :  { %1403 = vst [vmem:[#allocation3 + $0x88] sm:$0xff] %v1335_v63   ;;  %v568_v3 = vpop.f32.mrf.mxu3  ;;  %v796_v10 = vmul.f32 %v1611_v40, %v528_v0 }
  0xe6   :  { %1411 = vst [vmem:[#allocation3 + $0xc8] sm:$0xff] %v1375_v1   ;;  %v460_v5 = vpop.f32.mrf.mxu0  ;;  %v812_v9 = vmul.f32 %v1611_v40, %v568_v3 }
  0xe7   :  { %v769_v6 = vmul.f32 %v1611_v40, %v460_v5  ;;  %v495_v7 = vpop.f32.mrf.mxu1  ;;  %v857_v19 = vadd.f32 %v1618_v44, %v796_v10 }
  0xe8   :  { %v783_v8 = vmul.f32 %v1611_v40, %v495_v7  ;;  %v873_v18 = vadd.f32 %v1618_v44, %v812_v9 }
  0xe9   :  { %v830_v12 = vadd.f32 %v1618_v44, %v769_v6  ;;  %v914_v30 = vmax.f32 %v857_v19, 0.0 }
  0xea   :  { %v844_v14 = vadd.f32 %v1618_v44, %v783_v8  ;;  %v930_v28 = vmax.f32 %v873_v18, 0.0 }
  0xeb   :  { %v887_v15 = vmax.f32 %v830_v12, 0.0 }
  0xec   :  { %v530_v16 = vpop.f32.mrf.mxu2  ;;  %v901_v17 = vmax.f32 %v844_v14, 0.0 }
  0xed   :  { %v797_v20 = vmul.f32 %v1611_v40, %v530_v16  ;;  %v1270_v21 = vpack.c.bf16 %v887_v15, %v886_v11  ;;  %v570_v22 = vpop.f32.mrf.mxu3 }
  0xee   :  { %v1305_v23 = vpack.c.bf16 %v901_v17, %v900_v13  ;;  %v463_v24 = vpop.f32.mrf.mxu0  ;;  %v813_v25 = vmul.f32 %v1611_v40, %v570_v22 }
  0xef   :  { %v858_v26 = vadd.f32 %v1618_v44, %v797_v20  ;;  %1390 = vst [vmem:[#allocation3 + $0x20] sm:$0xff] %v1270_v21   ;;  %v498_v27 = vpop.f32.mrf.mxu1  ;;  %v770_v32 = vmul.f32 %v1611_v40, %v463_v24 }
  0xf0   :  { %1397 = vst [vmem:[#allocation3 + $0x58] sm:$0xff] %v1305_v23   ;;  %v874_v29 = vadd.f32 %v1618_v44, %v813_v25  ;;  %v784_v33 = vmul.f32 %v1611_v40, %v498_v27 }
  0xf1   :  { %v915_v31 = vmax.f32 %v858_v26, 0.0  ;;  %v831_v38 = vadd.f32 %v1618_v44, %v770_v32 }
  0xf2   :  { %v931_v34 = vmax.f32 %v874_v29, 0.0  ;;  %v845_v41 = vadd.f32 %v1618_v44, %v784_v33 }
  0xf3   :  { %v1340_v35 = vpack.c.bf16 %v915_v31, %v914_v30  ;;  %v888_v49 = vmax.f32 %v831_v38, 0.0 }
  0xf4   :  { %v533_v36 = vpop.f32.mrf.mxu2  ;;  %v1380_v37 = vpack.c.bf16 %v931_v34, %v930_v28  ;;  %v902_v51 = vmax.f32 %v845_v41, 0.0 }
  0xf5   :  { %1404 = vst [vmem:[#allocation3 + $0x90] sm:$0xff] %v1340_v35   ;;  %v573_v39 = vpop.f32.mrf.mxu3  ;;  %v798_v48 = vmul.f32 %v1611_v40, %v533_v36 }
  0xf6   :  { %1412 = vst [vmem:[#allocation3 + $0xd0] sm:$0xff] %v1380_v37   ;;  %v465_v42 = vpop.f32.mrf.mxu0  ;;  %v814_v47 = vmul.f32 %v1611_v40, %v573_v39 }
  0xf7   :  { %v771_v43 = vmul.f32 %v1611_v40, %v465_v42  ;;  %v500_v45 = vpop.f32.mrf.mxu1  ;;  %v859_v57 = vadd.f32 %v1618_v44, %v798_v48 }
  0xf8   :  { %v785_v46 = vmul.f32 %v1611_v40, %v500_v45  ;;  %v875_v56 = vadd.f32 %v1618_v44, %v814_v47 }
  0xf9   :  { %v832_v50 = vadd.f32 %v1618_v44, %v771_v43  ;;  %v916_v4 = vmax.f32 %v859_v57, 0.0 }
  0xfa   :  { %v846_v52 = vadd.f32 %v1618_v44, %v785_v46  ;;  %v932_v2 = vmax.f32 %v875_v56, 0.0 }
  0xfb   :  { %v889_v53 = vmax.f32 %v832_v50, 0.0 }
  0xfc   :  { %v535_v54 = vpop.f32.mrf.mxu2  ;;  %v903_v55 = vmax.f32 %v846_v52, 0.0 }
  0xfd   :  { %v799_v58 = vmul.f32 %v1611_v40, %v535_v54  ;;  %v1275_v59 = vpack.c.bf16 %v889_v53, %v888_v49  ;;  %v575_v60 = vpop.f32.mrf.mxu3 }
  0xfe   :  { %v1310_v61 = vpack.c.bf16 %v903_v55, %v902_v51  ;;  %v468_v62 = vpop.f32.mrf.mxu0  ;;  %v815_v63 = vmul.f32 %v1611_v40, %v575_v60 }
  0xff   :  { %v860_v0 = vadd.f32 %v1618_v44, %v799_v58  ;;  %1391 = vst [vmem:[#allocation3 + $0x28] sm:$0xff] %v1275_v59   ;;  %v503_v1 = vpop.f32.mrf.mxu1  ;;  %v772_v6 = vmul.f32 %v1611_v40, %v468_v62 }
 0x100   :  { %1398 = vst [vmem:[#allocation3 + $0x60] sm:$0xff] %v1310_v61   ;;  %v876_v3 = vadd.f32 %v1618_v44, %v815_v63  ;;  %v786_v7 = vmul.f32 %v1611_v40, %v503_v1 }
 0x101   :  { %v917_v5 = vmax.f32 %v860_v0, 0.0  ;;  %v833_v12 = vadd.f32 %v1618_v44, %v772_v6 }
 0x102   :  { %v933_v8 = vmax.f32 %v876_v3, 0.0  ;;  %v847_v14 = vadd.f32 %v1618_v44, %v786_v7 }
 0x103   :  { %v1345_v9 = vpack.c.bf16 %v917_v5, %v916_v4  ;;  %v890_v22 = vmax.f32 %v833_v12, 0.0 }
 0x104   :  { %v538_v10 = vpop.f32.mrf.mxu2  ;;  %v1385_v11 = vpack.c.bf16 %v933_v8, %v932_v2  ;;  %v904_v24 = vmax.f32 %v847_v14, 0.0 }
 0x105   :  { %1405 = vst [vmem:[#allocation3 + $0x98] sm:$0xff] %v1345_v9   ;;  %v578_v13 = vpop.f32.mrf.mxu3  ;;  %v800_v21 = vmul.f32 %v1611_v40, %v538_v10 }
 0x106   :  { %1413 = vst [vmem:[#allocation3 + $0xd8] sm:$0xff] %v1385_v11   ;;  %v470_v15 = vpop.f32.mrf.mxu0  ;;  %v816_v16 = vmul.f32 %v1611_v40, %v578_v13 }
 0x107   :  { %v773_v17 = vmul.f32 %v1611_v40, %v470_v15  ;;  %v505_v18 = vpop.f32.mrf.mxu1  ;;  %v861_v31 = vadd.f32 %v1618_v44, %v800_v21 }
 0x108   :  { %v787_v19 = vmul.f32 %v1611_v40, %v505_v18  ;;  %v877_v20 = vadd.f32 %v1618_v44, %v816_v16 }
 0x109   :  { %v834_v23 = vadd.f32 %v1618_v44, %v773_v17  ;;  %v918_v37 = vmax.f32 %v861_v31, 0.0 }
 0x10a   :  { %v848_v25 = vadd.f32 %v1618_v44, %v787_v19  ;;  %v934_v26 = vmax.f32 %v877_v20, 0.0 }
 0x10b   :  { %v891_v27 = vmax.f32 %v834_v23, 0.0 }
 0x10c   :  { %v540_v28 = vpop.f32.mrf.mxu2  ;;  %v905_v29 = vmax.f32 %v848_v25, 0.0  ;;  %v991_v30 = vpack.c.bf16 %v934_v26, %v934_v26 }
 0x10d   :  { %v801_v32 = vmul.f32 %v1611_v40, %v540_v28  ;;  %v1280_v33 = vpack.c.bf16 %v891_v27, %v890_v22  ;;  %v580_v34 = vpop.f32.mrf.mxu3 }
 0x10e   :  { %v1315_v35 = vpack.c.bf16 %v905_v29, %v904_v24  ;;  %1048 = vst [vmem:[#allocation3 + $0xe0] sm:$0xf] %v991_v30 }
 0x10f   :  { %v862_v36 = vadd.f32 %v1618_v44, %v801_v32  ;;  %1392 = vst [vmem:[#allocation3 + $0x30] sm:$0xff] %v1280_v33  }
 0x110   :  { %1399 = vst [vmem:[#allocation3 + $0x68] sm:$0xff] %v1315_v35  }
 0x111   :  { %v919_v38 = vmax.f32 %v862_v36, 0.0 }
 0x113   :  { %v1350_v39 = vpack.c.bf16 %v919_v38, %v918_v37 }
 0x114   :  { %v543_v41 = vpop.f32.mrf.mxu2 }
 0x115   :  { %1406 = vst [vmem:[#allocation3 + $0xa0] sm:$0xff] %v1350_v39   ;;  %v802_v42 = vmul.f32 %v1611_v40, %v543_v41 }
 0x117   :  { %v863_v45 = vadd.f32 %v1618_v44, %v802_v42 }
 0x119   :  { %v920_v48 = vmax.f32 %v863_v45, 0.0 }
 0x11c   :  { %v545_v43 = vpop.f32.mrf.mxu2 }
 0x11d   :  { %v803_v46 = vmul.f32 %v1611_v40, %v545_v43 }
 0x11f   :  { %v864_v47 = vadd.f32 %v1618_v44, %v803_v46 }
 0x121   :  { %v921_v49 = vmax.f32 %v864_v47, 0.0 }
 0x123   :  { %v1355_v50 = vpack.c.bf16 %v921_v49, %v920_v48 }
 0x125   :  { %1407 = vst [vmem:[#allocation3 + $0xa8] sm:$0xff] %v1355_v50  }
 0x126   :  { %1061 = dma.vmem_to_hbm [thread:$0]  %s1054_s2, 3648, %s1056_s13, [#allocation4], %s1470_s14, %s1470_s14, %s1471_s15  }
 0x127   :  { %1467 = dma.done.wait [#allocation4], 3648  }
 0x128   :  { %1468 = vsyncadd [#allocation4], 4294963648 }
 0x129   :  { %1066 = vsyncpa [#allocation4], 1 }

</bundles_post_ra>
